<compile_context>
chip_gen: v6e
topology: v6e:2x2x1
jax: 0.10.0
libtpu: 0.0.40
codegen_flags: <defaults>
</compile_context>

<pallas_src>
import math

import jax
import jax.numpy as jnp
from jax.experimental import pallas as pl
from jax.experimental.pallas import tpu as pltpu


def _round_up(x, m):
    return ((x + m - 1) // m) * m


def _pick_tile(n, target, granule):
    """Largest tile t <= target with t % granule == 0 and n % t == 0.

    Falls back to the full dimension n (always legal for a BlockSpec)."""
    if n <= target:
        return n
    t = (target // granule) * granule
    while t >= granule:
        if n % t == 0:
            return t
        t -= granule
    return n


def _hgnn_layer_kernel(x_ref, w_ref, b_ref, g_ref, o_ref, acc_ref):
    # x:(TK,Fin) bf16, w:(Fin,FPAD) bf16, b:(1,FPAD) f32, g:(TM,TK) bf16
    # o:(TM,FPAD), acc:(TM,FPAD) f32
    k = pl.program_id(1)

    @pl.when(k == 0)
    def _():
        acc_ref[...] = jnp.zeros_like(acc_ref)

    # xw = x_k @ W + b  (f32), then stream back through the MXU as bf16.
    # The recompute of xw across row tiles is hidden under the dominant
    # G-tile DMA (kernel is HBM-bound on G), so fusion is a net win: it
    # avoids an HBM round-trip of the transformed features.
    xw = jnp.dot(x_ref[...], w_ref[...], preferred_element_type=jnp.float32)
    xw = xw + b_ref[...]
    acc_ref[...] += jnp.dot(
        g_ref[...], xw.astype(g_ref.dtype), preferred_element_type=jnp.float32
    )

    @pl.when(k == pl.num_programs(1) - 1)
    def _():
        o_ref[...] = jnp.maximum(acc_ref[...], 0.0).astype(o_ref.dtype)


def hgnn_conv_layer(x, w, b, g, *, out_dtype, tm_target=512, tk_target=1024):
    """One HGNN_conv layer + ReLU: relu(G @ (x @ w + b)), tiled over G."""
    n, fin = x.shape
    fout = w.shape[1]          # already lane-padded (multiple of 128)
    b2d = b.reshape(1, fout)

    tm = _pick_tile(n, tm_target, 8)     # row tile (sublane granule)
    tk = _pick_tile(n, tk_target, 128)   # contraction tile (lane granule)
    grid = (n // tm, n // tk)

    return pl.pallas_call(
        _hgnn_layer_kernel,
        out_shape=jax.ShapeDtypeStruct((n, fout), out_dtype),
        grid_spec=pltpu.PrefetchScalarGridSpec(
            num_scalar_prefetch=0,
            grid=grid,
            in_specs=[
                pl.BlockSpec((tk, fin), lambda i, k: (k, 0)),    # x row-tile
                pl.BlockSpec((fin, fout), lambda i, k: (0, 0)),  # W resident
                pl.BlockSpec((1, fout), lambda i, k: (0, 0)),    # b resident
                pl.BlockSpec((tm, tk), lambda i, k: (i, k)),     # G tile
            ],
            out_specs=pl.BlockSpec((tm, fout), lambda i, k: (i, 0)),
            scratch_shapes=[pltpu.VMEM((tm, fout), jnp.float32)],
        ),
        compiler_params=pltpu.CompilerParams(
            dimension_semantics=("parallel", "arbitrary"),
            vmem_limit_bytes=64 * 1024 * 1024,
        ),
    )(x, w, b2d, g)


def hgnn_forward(x, g, params):
    """Full HGNN forward pass (inference / eval mode)."""
    w1, b1, w2, b2 = params
    hid = w1.shape[1]
    fpad = max(128, _round_up(hid, 128))   # lane-dense hidden width

    # bf16 streaming operands, f32 bias / accumulation.
    g_bf = g.astype(jnp.bfloat16)
    x_bf = x.astype(jnp.bfloat16)
    w1p = jnp.pad(w1, ((0, 0), (0, fpad - hid))).astype(jnp.bfloat16)
    b1p = jnp.pad(b1, (0, fpad - hid)).astype(jnp.float32)
    w2p = jnp.pad(w2, ((0, fpad - hid), (0, fpad - hid))).astype(jnp.bfloat16)
    b2p = jnp.pad(b2, (0, fpad - hid)).astype(jnp.float32)

    # Layer 1: keep the (lane-padded) activations in bf16 for layer 2's stream.
    h1 = hgnn_conv_layer(x_bf, w1p, b1p, g_bf, out_dtype=jnp.bfloat16)
    # TODO(synk): F.dropout(p=0.5) is stochastic at train time; eval-mode
    # (identity) semantics are implemented here.
    h2 = hgnn_conv_layer(h1, w2p, b2p, g_bf, out_dtype=jnp.float32)
    return h2[:, :hid]


def init_hgnn_params(key, in_ch, hid_ch=32):
    """Deterministic init matching HGNN_conv.reset_parameters (U[-stdv, stdv])."""
    k1, k2, k3, k4 = jax.random.split(key, 4)
    stdv1 = 1.0 / math.sqrt(hid_ch)
    w1 = jax.random.uniform(k1, (in_ch, hid_ch), jnp.float32, -stdv1, stdv1)
    b1 = jax.random.uniform(k2, (hid_ch,), jnp.float32, -stdv1, stdv1)
    stdv2 = 1.0 / math.sqrt(hid_ch)
    w2 = jax.random.uniform(k3, (hid_ch, hid_ch), jnp.float32, -stdv2, stdv2)
    b2 = jax.random.uniform(k4, (hid_ch,), jnp.float32, -stdv2, stdv2)
    return (w1, b1, w2, b2)


def _reference_forward(x, g, params):
    """Pure-jnp f32 reference for a sanity check."""
    w1, b1, w2, b2 = params
    h = jnp.maximum(g @ (x @ w1 + b1), 0.0)
    h = jnp.maximum(g @ (h @ w2 + b2), 0.0)
    return h


if __name__ == "__main__":
    key = jax.random.PRNGKey(0)
    kx, kg, kp = jax.random.split(key, 3)

    N = 16        # number of nodes
    IN_CH = 8     # input feature dim
    HID = 32      # hidden dim

    x = jax.random.normal(kx, (N, IN_CH), jnp.float32)
    # Dense surrogate for the (sparse) hypergraph Laplacian G, row-normalized.
    g_raw = jax.random.uniform(kg, (N, N), jnp.float32)
    g = g_raw / jnp.sum(g_raw, axis=1, keepdims=True)

    params = init_hgnn_params(kp, IN_CH, HID)

    out = jax.jit(hgnn_forward)(x, g, params)
    out = jax.block_until_ready(out)

    assert out.shape == (N, HID)
    assert bool(jnp.all(out >= 0.0))  # ReLU output

    # Loose tolerance: kernel streams in bf16, reference is pure f32.
    ref = _reference_forward(x, g, params)
    assert bool(jnp.allclose(out, ref, rtol=1e-1, atol=5e-2))

    print("KERNEL_OK")
</pallas_src>

<mosaic_0001>
module attributes {stable_mosaic.version = 11 : i64} {
  func.func @_hgnn_layer_kernel(%arg0: i32, %arg1: i32, %arg2: memref<16x8xbf16, #tpu.memory_space<vmem>>, %arg3: memref<8x128xbf16, #tpu.memory_space<vmem>>, %arg4: memref<1x128xf32, #tpu.memory_space<vmem>>, %arg5: memref<16x16xbf16, #tpu.memory_space<vmem>>, %arg6: memref<16x128xbf16, #tpu.memory_space<vmem>>, %arg7: memref<16x128xf32, #tpu.memory_space<vmem>>) attributes {dimension_semantics = [#tpu.dimension_semantics<parallel>, #tpu.dimension_semantics<arbitrary>], iteration_bounds = array<i64: 1, 1>, scalar_prefetch = 0 : i64, scratch_operands = 1 : i64, tpu.core_type = #tpu.core_type<tc>, window_params = [{transform_indices = @transform_0, window_bounds = array<i64: 16, 8>}, {pipeline_mode = #tpu.pipeline_mode<synchronous>, transform_indices = @transform_1, window_bounds = array<i64: 8, 128>}, {pipeline_mode = #tpu.pipeline_mode<synchronous>, transform_indices = @transform_2, window_bounds = array<i64: 1, 128>}, {transform_indices = @transform_3, window_bounds = array<i64: 16, 16>}, {transform_indices = @transform_4, window_bounds = array<i64: 16, 128>}]} {
    %c0_i32 = arith.constant 0 : i32
    %0 = arith.cmpi eq, %arg1, %c0_i32 : i32
    %1 = arith.extui %0 : i1 to i32
    %c0_i32_0 = arith.constant 0 : i32
    %2 = arith.cmpi ne, %1, %c0_i32_0 : i32
    scf.if %2 {
      %cst_15 = arith.constant 0.000000e+00 : f32
      %18 = vector.broadcast %cst_15 : f32 to vector<16x128xf32>
      %c0_16 = arith.constant 0 : index
      %c0_17 = arith.constant 0 : index
      %19 = vector.load %arg7[%c0_16, %c0_17] : memref<16x128xf32, #tpu.memory_space<vmem>>, vector<16x128xf32>
      tpu.vector_store %arg7[%c0_16, %c0_17], %18 {strides = array<i32>} : memref<16x128xf32, #tpu.memory_space<vmem>>, vector<16x128xf32>,
    } else {
    }
    %c0 = arith.constant 0 : index
    %c0_1 = arith.constant 0 : index
    %3 = vector.load %arg2[%c0, %c0_1] : memref<16x8xbf16, #tpu.memory_space<vmem>>, vector<16x8xbf16>
    %c0_2 = arith.constant 0 : index
    %c0_3 = arith.constant 0 : index
    %4 = vector.load %arg3[%c0_2, %c0_3] : memref<8x128xbf16, #tpu.memory_space<vmem>>, vector<8x128xbf16>
    %cst = arith.constant dense<0.000000e+00> : vector<16x128xf32>
    %5 = tpu.matmul %3, %4, %cst {dimension_numbers = #tpu.dot_dimension_numbers<[1], [0], [0], [1], [0, 0, 1, 1], [], []>} : vector<16x8xbf16>, vector<8x128xbf16>, vector<16x128xf32> -> vector<16x128xf32>
    %c0_4 = arith.constant 0 : index
    %c0_5 = arith.constant 0 : index
    %6 = vector.load %arg4[%c0_4, %c0_5] : memref<1x128xf32, #tpu.memory_space<vmem>>, vector<1x128xf32>
    %7 = vector.broadcast %6 : vector<1x128xf32> to vector<16x128xf32>
    %8 = arith.addf %5, %7 : vector<16x128xf32>
    %c0_6 = arith.constant 0 : index
    %c0_7 = arith.constant 0 : index
    %9 = vector.load %arg7[%c0_6, %c0_7] : memref<16x128xf32, #tpu.memory_space<vmem>>, vector<16x128xf32>
    %c0_8 = arith.constant 0 : index
    %c0_9 = arith.constant 0 : index
    %10 = vector.load %arg5[%c0_8, %c0_9] : memref<16x16xbf16, #tpu.memory_space<vmem>>, vector<16x16xbf16>
    %11 = arith.truncf %8 : vector<16x128xf32> to vector<16x128xbf16>
    %cst_10 = arith.constant dense<0.000000e+00> : vector<16x128xf32>
    %12 = tpu.matmul %10, %11, %cst_10 {dimension_numbers = #tpu.dot_dimension_numbers<[1], [0], [0], [1], [0, 0, 1, 1], [], []>} : vector<16x16xbf16>, vector<16x128xbf16>, vector<16x128xf32> -> vector<16x128xf32>
    %13 = arith.addf %9, %12 : vector<16x128xf32>
    %c0_11 = arith.constant 0 : index
    %c0_12 = arith.constant 0 : index
    %14 = vector.load %arg7[%c0_11, %c0_12] : memref<16x128xf32, #tpu.memory_space<vmem>>, vector<16x128xf32>
    tpu.vector_store %arg7[%c0_11, %c0_12], %13 {strides = array<i32>} : memref<16x128xf32, #tpu.memory_space<vmem>>, vector<16x128xf32>,
    %c0_i32_13 = arith.constant 0 : i32
    %15 = arith.cmpi eq, %arg1, %c0_i32_13 : i32
    %16 = arith.extui %15 : i1 to i32
    %c0_i32_14 = arith.constant 0 : i32
    %17 = arith.cmpi ne, %16, %c0_i32_14 : i32
    scf.if %17 {
      %c0_15 = arith.constant 0 : index
      %c0_16 = arith.constant 0 : index
      %18 = vector.load %arg7[%c0_15, %c0_16] : memref<16x128xf32, #tpu.memory_space<vmem>>, vector<16x128xf32>
      %cst_17 = arith.constant 0.000000e+00 : f32
      %19 = vector.broadcast %cst_17 : f32 to vector<16x128xf32>
      %20 = arith.maximumf %18, %19 : vector<16x128xf32>
      %21 = arith.truncf %20 : vector<16x128xf32> to vector<16x128xbf16>
      %c0_18 = arith.constant 0 : index
      %c0_19 = arith.constant 0 : index
      %22 = vector.load %arg6[%c0_18, %c0_19] : memref<16x128xbf16, #tpu.memory_space<vmem>>, vector<16x128xbf16>
      tpu.vector_store %arg6[%c0_18, %c0_19], %21 {strides = array<i32>} : memref<16x128xbf16, #tpu.memory_space<vmem>>, vector<16x128xbf16>,
    } else {
    }
    return
  }
  func.func @transform_0(%arg0: i32, %arg1: i32) -> (i32, i32) {
    %c0_i32 = arith.constant 0 : i32
    %c0_i32_0 = arith.constant 0 : i32
    return %arg1, %c0_i32 : i32, i32
  }
  func.func @transform_1(%arg0: i32, %arg1: i32) -> (i32, i32) {
    %c0_i32 = arith.constant 0 : i32
    %c0_i32_0 = arith.constant 0 : i32
    %c0_i32_1 = arith.constant 0 : i32
    return %c0_i32, %c0_i32_0 : i32, i32
  }
  func.func @transform_2(%arg0: i32, %arg1: i32) -> (i32, i32) {
    %c0_i32 = arith.constant 0 : i32
    %c0_i32_0 = arith.constant 0 : i32
    %c0_i32_1 = arith.constant 0 : i32
    return %c0_i32, %c0_i32_0 : i32, i32
  }
  func.func @transform_3(%arg0: i32, %arg1: i32) -> (i32, i32) {
    %c0_i32 = arith.constant 0 : i32
    return %arg0, %arg1 : i32, i32
  }
  func.func @transform_4(%arg0: i32, %arg1: i32) -> (i32, i32) {
    %c0_i32 = arith.constant 0 : i32
    %c0_i32_0 = arith.constant 0 : i32
    return %arg0, %c0_i32 : i32, i32
  }
}

module attributes {stable_mosaic.version = 11 : i64} {
  func.func @_hgnn_layer_kernel(%arg0: i32, %arg1: i32, %arg2: memref<16x128xbf16, #tpu.memory_space<vmem>>, %arg3: memref<128x128xbf16, #tpu.memory_space<vmem>>, %arg4: memref<1x128xf32, #tpu.memory_space<vmem>>, %arg5: memref<16x16xbf16, #tpu.memory_space<vmem>>, %arg6: memref<16x128xf32, #tpu.memory_space<vmem>>, %arg7: memref<16x128xf32, #tpu.memory_space<vmem>>) attributes {dimension_semantics = [#tpu.dimension_semantics<parallel>, #tpu.dimension_semantics<arbitrary>], iteration_bounds = array<i64: 1, 1>, scalar_prefetch = 0 : i64, scratch_operands = 1 : i64, tpu.core_type = #tpu.core_type<tc>, window_params = [{transform_indices = @transform_0, window_bounds = array<i64: 16, 128>}, {pipeline_mode = #tpu.pipeline_mode<synchronous>, transform_indices = @transform_1, window_bounds = array<i64: 128, 128>}, {pipeline_mode = #tpu.pipeline_mode<synchronous>, transform_indices = @transform_2, window_bounds = array<i64: 1, 128>}, {transform_indices = @transform_3, window_bounds = array<i64: 16, 16>}, {transform_indices = @transform_4, window_bounds = array<i64: 16, 128>}]} {
    %c0_i32 = arith.constant 0 : i32
    %0 = arith.cmpi eq, %arg1, %c0_i32 : i32
    %1 = arith.extui %0 : i1 to i32
    %c0_i32_0 = arith.constant 0 : i32
    %2 = arith.cmpi ne, %1, %c0_i32_0 : i32
    scf.if %2 {
      %cst_15 = arith.constant 0.000000e+00 : f32
      %18 = vector.broadcast %cst_15 : f32 to vector<16x128xf32>
      %c0_16 = arith.constant 0 : index
      %c0_17 = arith.constant 0 : index
      %19 = vector.load %arg7[%c0_16, %c0_17] : memref<16x128xf32, #tpu.memory_space<vmem>>, vector<16x128xf32>
      tpu.vector_store %arg7[%c0_16, %c0_17], %18 {strides = array<i32>} : memref<16x128xf32, #tpu.memory_space<vmem>>, vector<16x128xf32>,
    } else {
    }
    %c0 = arith.constant 0 : index
    %c0_1 = arith.constant 0 : index
    %3 = vector.load %arg2[%c0, %c0_1] : memref<16x128xbf16, #tpu.memory_space<vmem>>, vector<16x128xbf16>
    %c0_2 = arith.constant 0 : index
    %c0_3 = arith.constant 0 : index
    %4 = vector.load %arg3[%c0_2, %c0_3] : memref<128x128xbf16, #tpu.memory_space<vmem>>, vector<128x128xbf16>
    %cst = arith.constant dense<0.000000e+00> : vector<16x128xf32>
    %5 = tpu.matmul %3, %4, %cst {dimension_numbers = #tpu.dot_dimension_numbers<[1], [0], [0], [1], [0, 0, 1, 1], [], []>} : vector<16x128xbf16>, vector<128x128xbf16>, vector<16x128xf32> -> vector<16x128xf32>
    %c0_4 = arith.constant 0 : index
    %c0_5 = arith.constant 0 : index
    %6 = vector.load %arg4[%c0_4, %c0_5] : memref<1x128xf32, #tpu.memory_space<vmem>>, vector<1x128xf32>
    %7 = vector.broadcast %6 : vector<1x128xf32> to vector<16x128xf32>
    %8 = arith.addf %5, %7 : vector<16x128xf32>
    %c0_6 = arith.constant 0 : index
    %c0_7 = arith.constant 0 : index
    %9 = vector.load %arg7[%c0_6, %c0_7] : memref<16x128xf32, #tpu.memory_space<vmem>>, vector<16x128xf32>
    %c0_8 = arith.constant 0 : index
    %c0_9 = arith.constant 0 : index
    %10 = vector.load %arg5[%c0_8, %c0_9] : memref<16x16xbf16, #tpu.memory_space<vmem>>, vector<16x16xbf16>
    %11 = arith.truncf %8 : vector<16x128xf32> to vector<16x128xbf16>
    %cst_10 = arith.constant dense<0.000000e+00> : vector<16x128xf32>
    %12 = tpu.matmul %10, %11, %cst_10 {dimension_numbers = #tpu.dot_dimension_numbers<[1], [0], [0], [1], [0, 0, 1, 1], [], []>} : vector<16x16xbf16>, vector<16x128xbf16>, vector<16x128xf32> -> vector<16x128xf32>
    %13 = arith.addf %9, %12 : vector<16x128xf32>
    %c0_11 = arith.constant 0 : index
    %c0_12 = arith.constant 0 : index
    %14 = vector.load %arg7[%c0_11, %c0_12] : memref<16x128xf32, #tpu.memory_space<vmem>>, vector<16x128xf32>
    tpu.vector_store %arg7[%c0_11, %c0_12], %13 {strides = array<i32>} : memref<16x128xf32, #tpu.memory_space<vmem>>, vector<16x128xf32>,
    %c0_i32_13 = arith.constant 0 : i32
    %15 = arith.cmpi eq, %arg1, %c0_i32_13 : i32
    %16 = arith.extui %15 : i1 to i32
    %c0_i32_14 = arith.constant 0 : i32
    %17 = arith.cmpi ne, %16, %c0_i32_14 : i32
    scf.if %17 {
      %c0_15 = arith.constant 0 : index
      %c0_16 = arith.constant 0 : index
      %18 = vector.load %arg7[%c0_15, %c0_16] : memref<16x128xf32, #tpu.memory_space<vmem>>, vector<16x128xf32>
      %cst_17 = arith.constant 0.000000e+00 : f32
      %19 = vector.broadcast %cst_17 : f32 to vector<16x128xf32>
      %20 = arith.maximumf %18, %19 : vector<16x128xf32>
      %c0_18 = arith.constant 0 : index
      %c0_19 = arith.constant 0 : index
      %21 = vector.load %arg6[%c0_18, %c0_19] : memref<16x128xf32, #tpu.memory_space<vmem>>, vector<16x128xf32>
      tpu.vector_store %arg6[%c0_18, %c0_19], %20 {strides = array<i32>} : memref<16x128xf32, #tpu.memory_space<vmem>>, vector<16x128xf32>,
    } else {
    }
    return
  }
  func.func @transform_0(%arg0: i32, %arg1: i32) -> (i32, i32) {
    %c0_i32 = arith.constant 0 : i32
    %c0_i32_0 = arith.constant 0 : i32
    return %arg1, %c0_i32 : i32, i32
  }
  func.func @transform_1(%arg0: i32, %arg1: i32) -> (i32, i32) {
    %c0_i32 = arith.constant 0 : i32
    %c0_i32_0 = arith.constant 0 : i32
    %c0_i32_1 = arith.constant 0 : i32
    return %c0_i32, %c0_i32_0 : i32, i32
  }
  func.func @transform_2(%arg0: i32, %arg1: i32) -> (i32, i32) {
    %c0_i32 = arith.constant 0 : i32
    %c0_i32_0 = arith.constant 0 : i32
    %c0_i32_1 = arith.constant 0 : i32
    return %c0_i32, %c0_i32_0 : i32, i32
  }
  func.func @transform_3(%arg0: i32, %arg1: i32) -> (i32, i32) {
    %c0_i32 = arith.constant 0 : i32
    return %arg0, %arg1 : i32, i32
  }
  func.func @transform_4(%arg0: i32, %arg1: i32) -> (i32, i32) {
    %c0_i32 = arith.constant 0 : i32
    %c0_i32_0 = arith.constant 0 : i32
    return %arg0, %c0_i32 : i32, i32
  }
}

</mosaic_0001>

<bundles_post_ra>
// kernel: hgnn_forward.2
= control target key start
LH: loop header
LB: loop body
LE: loop exit
PB: predicated region body
PF: predicated region fallthrough
CT: control target
= control target key end

     0   :  { %vm43_vm0 = vcmask 1043456   ;;  %v202_v0 = vmov 0.0   ;;  %vm203_vm1 = vmmov 0   ;;  %vm39_vm2 = vcmask 64512   ;;  %s244_s1 = inlined_call_operand.vmem [shape: bf16[8,128], index: 1, kind: input, shape index: {}]   ;;  %s245_s0 = inlined_call_operand.vmem [shape: bf16[16,8], index: 0, kind: input, shape index: {}]   ;;  %s246_s3 = inlined_call_operand.vmem [shape: bf16[16,16], index: 3, kind: input, shape index: {}]   ;;  %s247_s2 = inlined_call_operand.vmem [shape: f32[1,128], index: 2, kind: input, shape index: {}]   ;;  %s248_s4 = inlined_call_operand.vmem [shape: bf16[16,128], index: 4, kind: output, shape index: {}]  }
   0x1   :  { %186 = vmatprep.subr.bf16.mxu0 %v202_v0  ;;  %v26_v1 = vld [vmem:[%s244_s1] sm:$0xf]  ;;  %188 = vmatprep.mubr.msk.bf16.mxu0 %vm203_vm1, %v202_v0  ;;  %vm98_vm3 = vcmask 130048  }
   0x2   :  { %v45_v2 = vsel %vm43_vm0, %v26_v1, 0  ;;  %v200_v3 = vld [vmem:[%s245_s0] sm:$0xff]   ;;  %192 = vmatprep.subr.bf16.mxu1 %v202_v0  ;;  %194 = vmatprep.mubr.msk.bf16.mxu1 %vm203_vm1, %v202_v0 }
   0x3   :  { %187 = vmatpush3.bf16.msra.mxu0 %v45_v2  ;;  %v168_v5 = vld [vmem:[%s247_s2] ss:$0 sm:$0xff] }
   0x4   :  { %v201_v12 = vld [vmem:[%s246_s3] sm:$0xff]  }
   0x6   :  { %189 = vmatmul.mubr.msk.bf16.vlgmr.msra.gmra.mxu0 %vm39_vm2, %v200_v3 }
  0xc6   :  { %v81_v4 = vpop.f32.mrf.mxu0 }
  0xc7   :  { %v82_v8 = vadd.f32 %v168_v5, %v81_v4 }
  0xc8   :  { %v190_v6 = vpop.f32.mrf.mxu0 }
  0xca   :  { %v84_v7 = vpop.f32.mrf.mxu0 }
  0xcb   :  { %v85_v9 = vadd.f32 %v168_v5, %v84_v7 }
  0xcc   :  { %v191_v10 = vpop.f32.mrf.mxu0 }
  0xcd   :  { %v92_v11 = vpack.c.bf16 %v85_v9, %v82_v8 }
  0xcf   :  { %193 = vmatpush3.bf16.msra.mxu1 %v92_v11 }
  0xd2   :  { %195 = vmatmul.mubr.msk.bf16.vlgmr.msra.gmra.mxu1 %vm98_vm3, %v201_v12 }
 0x192   :  { %v136_v13 = vpop.f32.mrf.mxu1 }
 0x193   :  { %v152_v16 = vmax.f32 %v136_v13, 0.0 }
 0x194   :  { %v196_v14 = vpop.f32.mrf.mxu1 }
 0x196   :  { %v139_v15 = vpop.f32.mrf.mxu1 }
 0x197   :  { %v153_v17 = vmax.f32 %v139_v15, 0.0 }
 0x198   :  { %v197_v18 = vpop.f32.mrf.mxu1 }
 0x199   :  { %v180_v19 = vpack.c.bf16 %v153_v17, %v152_v16 }
 0x19b   :  { %181 = vst [vmem:[%s248_s4] sm:$0xff] %v180_v19  }

// kernel: hgnn_forward.3
= control target key start
LH: loop header
LB: loop body
LE: loop exit
PB: predicated region body
PF: predicated region fallthrough
CT: control target
= control target key end

     0   :  { %v315_v1 = vmov 0.0   ;;  %vm316_vm0 = vmmov 0   ;;  %s381_s0 = inlined_call_operand.vmem [shape: bf16[16,128], index: 0, kind: input, shape index: {}]   ;;  %s382_s1 = inlined_call_operand.vmem [shape: bf16[128,128], index: 1, kind: input, shape index: {}]   ;;  %s383_s2 = inlined_call_operand.vmem [shape: f32[1,128], index: 2, kind: input, shape index: {}]   ;;  %s384_s3 = inlined_call_operand.vmem [shape: bf16[16,16], index: 3, kind: input, shape index: {}]   ;;  %s385_s4 = inlined_call_operand.hbm [shape: f32[16,128], index: 4, kind: output, shape index: {}]  }
   0x1   :  { %v283_v0 = vld [vmem:[%s382_s1 + $0x38] sm:$0xff]   ;;  %252 = vmatprep.subr.bf16.mxu0 %v315_v1  ;;  %272 = vmatprep.subr.bf16.mxu1 %v315_v1  ;;  %v284_v2 = vld [vmem:[%s382_s1 + $0x30] sm:$0xff]   ;;  %v285_v3 = vld [vmem:[%s382_s1 + $0x28] sm:$0xff]  }
   0x2   :  { %253 = vmatpush3.bf16.msra.mxu0 %v283_v0  ;;  %268 = vmatprep.mubr.msk.bf16.mxu0 %vm316_vm0, %v315_v1  ;;  %v286_v4 = vld [vmem:[%s382_s1 + $0x20] sm:$0xff]  }
   0x3   :  { %254 = vmatprep.subr.bf16.mxu0 %v315_v1  ;;  %274 = vmatprep.mubr.msk.bf16.mxu1 %vm316_vm0, %v315_v1 }
   0x6   :  { %255 = vmatpush3.bf16.msra.mxu0 %v284_v2 }
   0x7   :  { %256 = vmatprep.subr.bf16.mxu0 %v315_v1 }
   0xa   :  { %257 = vmatpush3.bf16.msra.mxu0 %v285_v3 }
   0xb   :  { %9 = vsyncpa [#allocation4], 0  ;;  %258 = vmatprep.subr.bf16.mxu0 %v315_v1  ;;  %v287_v5 = vld [vmem:[%s382_s1 + $0x18] sm:$0xff]   ;;  %v288_v6 = vld [vmem:[%s382_s1 + $0x10] sm:$0xff]   ;;  %vm155_vm1 = vcmask 130048  }
   0xc   :  { %v289_v7 = vld [vmem:[%s382_s1 + $0x8] sm:$0xff]   ;;  %v290_v8 = vld [vmem:[%s382_s1] sm:$0xff]  }
   0xd   :  { %v291_v9 = vld [vmem:[%s381_s0] sm:$0xff]   ;;  %s317_s0 = smov [#allocation3]  }
   0xe   :  { %259 = vmatpush3.bf16.msra.mxu0 %v286_v4  ;;  %v229_v11 = vld [vmem:[%s383_s2] ss:$0 sm:$0xff]  ;;  %s218_s10 = sshll.u32 %s317_s0, 4  ;;  %s219_s10 = int_to_ptr.vmem [resolvable:$true] %s218_s10 }
   0xf   :  { %260 = vmatprep.subr.bf16.mxu0 %v315_v1  ;;  %v292_v18 = vld [vmem:[%s384_s3] sm:$0xff]   ;;  %s293_s2 = scalar_lea.vmem %s219_s10, 256  ;;  %p298_p1 = scmp.lt.s32.totalorder %s219_s10, %s219_s10 }
  0x10   :  { %p294_p0 = scmp.ne.s32.totalorder %s219_s10, %s293_s2  ;;  %p299_p2 = scmp.lt.s32.totalorder %s293_s2, %s293_s2 }
  0x12   :  { %261 = vmatpush3.bf16.msra.mxu0 %v287_v5  ;;  %p300_p3 = por %p299_p2, %p298_p1 }
  0x13   :  { %262 = vmatprep.subr.bf16.mxu0 %v315_v1 }
  0x14   :  { %p301_p4 = pnand %p300_p3, %p294_p0 }
  0x16   :  { %263 = vmatpush3.bf16.msra.mxu0 %v288_v6 }
  0x17   :  { %264 = vmatprep.subr.bf16.mxu0 %v315_v1 }
  0x1a   :  { %265 = vmatpush3.bf16.msra.mxu0 %v289_v7 }
  0x1b   :  { %266 = vmatprep.subr.bf16.mxu0 %v315_v1 }
  0x1e   :  { %267 = vmatpush3.bf16.msra.mxu0 %v290_v8 }
  0x21   :  { %269 = vmatmul.mubr.bf16.vlgmr.msra.gmra.mxu0 %v291_v9 }
  0xe1   :  { %v138_v10 = vpop.f32.mrf.mxu0 }
  0xe2   :  { %v139_v14 = vadd.f32 %v229_v11, %v138_v10 }
  0xe3   :  { %v270_v12 = vpop.f32.mrf.mxu0 }
  0xe5   :  { %v141_v13 = vpop.f32.mrf.mxu0 }
  0xe6   :  { %v142_v15 = vadd.f32 %v229_v11, %v141_v13 }
  0xe7   :  { %v271_v16 = vpop.f32.mrf.mxu0 }
  0xe8   :  { %v149_v17 = vpack.c.bf16 %v142_v15, %v139_v14 }
  0xea   :  { %273 = vmatpush3.bf16.msra.mxu1 %v149_v17 }
  0xed   :  { %275 = vmatmul.mubr.msk.bf16.vlgmr.msra.gmra.mxu1 %vm155_vm1, %v292_v18 }
 0x1ad   :  { %v193_v19 = vpop.f32.mrf.mxu1 }
 0x1ae   :  { %v209_v20 = vmax.f32 %v193_v19, 0.0 }
 0x1af   :  { %v276_v21 = vpop.f32.mrf.mxu1 }
 0x1b0   :  { %211 = vst [vmem:[#allocation3] sm:$0xff] %v209_v20 }
 0x1b1   :  { %v196_v22 = vpop.f32.mrf.mxu1 }
 0x1b2   :  { %v210_v23 = vmax.f32 %v196_v22, 0.0 }
 0x1b3   :  { %v277_v24 = vpop.f32.mrf.mxu1 }
 0x1b4   :  { %212 = vst [vmem:[#allocation3 + $0x8] sm:$0xff] %v210_v23 }
 0x1b5   :  { %304 = shalt.err (!%p301_p4)
}
 0x1b6   :  { %s318_s3 = smov 128   ;;  %s319_s11 = smov 8  }
 0x1b7   :  { %224 = dma.vmem_to_hbm [thread:$0]  %s219_s10, 256, %s385_s4, [#allocation4], %s318_s3, %s318_s3, %s319_s11  }
 0x1b8   :  { %313 = dma.done.wait [#allocation4], 256  }
 0x1b9   :  { %314 = vsyncadd [#allocation4], 4294967040 }
 0x1ba   :  { %228 = vsyncpa [#allocation4], 1 }

</bundles_post_ra>
